<compile_context>
chip_gen: v7x
topology: tpu7x:2x2x1
jax: 0.10.0
libtpu: 0.0.40
codegen_flags: <defaults>
</compile_context>

<pallas_src>
import functools

import jax
import jax.numpy as jnp
from jax.experimental import pallas as pl
from jax.experimental.pallas import tpu as pltpu


def _pair(v):
    if isinstance(v, (list, tuple)):
        return v
    return (v, v)


def _round_up(x, m):
    return ((x + m - 1) // m) * m


def _matmul_bias_kernel(p_ref, w_ref, b_ref, o_ref, acc_ref):
    """Tiled im2col matmul: bf16 operands, f32 accumulator, f32 bias epilogue."""
    k = pl.program_id(1)

    @pl.when(k == 0)
    def _():
        acc_ref[...] = jnp.zeros_like(acc_ref)

    acc_ref[...] += jnp.dot(
        p_ref[...], w_ref[...], preferred_element_type=jnp.float32
    )

    @pl.when(k == pl.num_programs(1) - 1)
    def _():
        # Bias add stays f32 (v5e has no bf16 VPU); output is f32.
        o_ref[...] = acc_ref[...] + b_ref[...]


def _pallas_im2col_matmul(patches, w_mat, bias):
    """patches: (M, K) f32; w_mat: (K, Cout) f32; bias: (Cout,) f32 -> (M, Cout) f32."""
    m_dim, k_dim = patches.shape
    cout = w_mat.shape[1]

    # ---- tile sizes -------------------------------------------------------
    # TM: sublane dim, multiple of 8; cap at 512 so 2x(TM,TK)+2x(TK,NP)+acc
    # stays well inside the scoped VMEM limit on every generation (incl. v7x).
    tm = min(512, _round_up(m_dim, 8))
    kp = _round_up(k_dim, 128)
    tk = min(512, kp)
    kp = _round_up(kp, tk)
    mp = _round_up(m_dim, tm)
    np_ = _round_up(cout, 128)

    # ---- single-pass padding + bf16 cast for the MXU ----------------------
    p_pad = jnp.pad(patches, ((0, mp - m_dim), (0, kp - k_dim))).astype(jnp.bfloat16)
    w_pad = jnp.pad(w_mat, ((0, kp - k_dim), (0, np_ - cout))).astype(jnp.bfloat16)
    b_pad = jnp.pad(bias, (0, np_ - cout)).astype(jnp.float32)[None, :]  # (1, NP)

    grid = (mp // tm, kp // tk)

    # VMEM budget estimate (double-buffered inputs/outputs + accumulator),
    # with generous headroom but far below v7x's 64 MiB physical VMEM.
    vmem_need = (
        2 * (tm * tk * 2)       # patch tiles (bf16)
        + 2 * (tk * np_ * 2)    # weight tiles (bf16)
        + 2 * (1 * np_ * 4)     # bias (f32)
        + 2 * (tm * np_ * 4)    # output tiles (f32)
        + (tm * np_ * 4)        # accumulator scratch (f32)
    )
    vmem_limit = min(96 * 1024 * 1024, max(4 * vmem_need, 8 * 1024 * 1024))

    cost = pl.CostEstimate(
        flops=2 * mp * kp * np_,
        transcendentals=0,
        bytes_accessed=mp * kp * 2 + kp * np_ * 2 + mp * np_ * 4 + np_ * 4,
    )

    out_pad = pl.pallas_call(
        _matmul_bias_kernel,
        out_shape=jax.ShapeDtypeStruct((mp, np_), jnp.float32),
        grid_spec=pltpu.PrefetchScalarGridSpec(
            num_scalar_prefetch=0,
            grid=grid,
            in_specs=[
                pl.BlockSpec((tm, tk), lambda i, k: (i, k)),   # patches: M x K tiles
                pl.BlockSpec((tk, np_), lambda i, k: (k, 0)),  # weight: K tiles, N resident
                pl.BlockSpec((1, np_), lambda i, k: (0, 0)),   # bias: resident
            ],
            out_specs=pl.BlockSpec((tm, np_), lambda i, k: (i, 0)),
            scratch_shapes=[pltpu.VMEM((tm, np_), jnp.float32)],
        ),
        compiler_params=pltpu.CompilerParams(
            dimension_semantics=("parallel", "arbitrary"),
            vmem_limit_bytes=vmem_limit,
        ),
        cost_estimate=cost,
    )(p_pad, w_pad, b_pad)

    return out_pad[:m_dim, :cout]


@functools.partial(jax.jit, static_argnames=("kernel_size",))
def receiver_forward(x, weight, bias, kernel_size=3):
    """x: (N, Cin, H, W) f32; weight: (Cout, Cin, KH, KW); bias: (Cout,) -> (N, Cout, OH, OW)."""
    kh, kw = _pair(kernel_size)
    # Exact derivations from the PyTorch __init__ (validated for kernel_size=3).
    pad_h = (kh ** 2 - kh * 3) // 2 + 1
    pad_w = (kw ** 2 - kw * 3) // 2 + 1
    stride_h, stride_w = kh, kw
    dil_h, dil_w = kh - 1, kw - 1

    n, cin, h, w = x.shape
    cout = weight.shape[0]
    eff_kh = dil_h * (kh - 1) + 1
    eff_kw = dil_w * (kw - 1) + 1
    oh = (h + 2 * pad_h - eff_kh) // stride_h + 1
    ow = (w + 2 * pad_w - eff_kw) // stride_w + 1

    # --- im2col built directly in NHWC order (transpose the small input once) ---
    x_nhwc = x.transpose(0, 2, 3, 1)  # (N, H, W, Cin)
    x_pad = jnp.pad(x_nhwc, ((0, 0), (pad_h, pad_h), (pad_w, pad_w), (0, 0)))

    cols = []
    for ih in range(kh):
        for iw in range(kw):
            sl = x_pad[
                :,
                ih * dil_h: ih * dil_h + (oh - 1) * stride_h + 1: stride_h,
                iw * dil_w: iw * dil_w + (ow - 1) * stride_w + 1: stride_w,
                :,
            ]  # (N, OH, OW, Cin)
            cols.append(sl)
    # K ordering = tap-major, channel-inner: k = (ih*KW + iw)*Cin + ci
    patches = jnp.stack(cols, axis=3)                               # (N, OH, OW, KH*KW, Cin)
    patches = patches.reshape(n * oh * ow, kh * kw * cin)           # (M, K), lane-contiguous K

    # Reorder the (tiny) weight to match: (KH, KW, Cin, Cout) flattened on K.
    w_mat = weight.transpose(2, 3, 1, 0).reshape(kh * kw * cin, cout)

    out_flat = _pallas_im2col_matmul(patches, w_mat, bias)          # (M, Cout) f32

    # NCHW to match the PyTorch module output (fuse/skip if consumer takes NHWC).
    out = out_flat.reshape(n, oh, ow, cout).transpose(0, 3, 1, 2)
    return out


if __name__ == "__main__":
    key = jax.random.PRNGKey(0)
    k1, k2, k3 = jax.random.split(key, 3)

    in_channels, out_channels, ks = 4, 8, 3
    x = jax.random.normal(k1, (2, in_channels, 16, 16), jnp.float32)
    # Deterministic synthetic parameters (shapes from nn.Conv2d(in, out, 3)):
    weight = 0.1 * jax.random.normal(k2, (out_channels, in_channels, ks, ks), jnp.float32)
    bias = 0.1 * jax.random.normal(k3, (out_channels,), jnp.float32)

    out = receiver_forward(x, weight, bias, kernel_size=ks)
    out = jax.block_until_ready(out)

    # Reference: same conv via lax (stride 3, pad 1, dilation 2), NCHW/OIHW, f32.
    ref = jax.lax.conv_general_dilated(
        x, weight,
        window_strides=(3, 3),
        padding=((1, 1), (1, 1)),
        rhs_dilation=(2, 2),
        dimension_numbers=("NCHW", "OIHW", "NCHW"),
    ) + bias[None, :, None, None]

    assert out.shape == ref.shape == (2, out_channels, 5, 5), (out.shape, ref.shape)
    # bf16 operands with f32 accumulation -> slightly looser tolerance.
    assert float(jnp.max(jnp.abs(out - ref))) < 2e-2, float(jnp.max(jnp.abs(out - ref)))
    print("KERNEL_OK")
</pallas_src>

<mosaic_0001>
module attributes {stable_mosaic.version = 11 : i64} {
  func.func @_matmul_bias_kernel(%arg0: i32, %arg1: i32, %arg2: memref<56x128xbf16, #tpu.memory_space<vmem>>, %arg3: memref<128x128xbf16, #tpu.memory_space<vmem>>, %arg4: memref<1x128xf32, #tpu.memory_space<vmem>>, %arg5: memref<56x128xf32, #tpu.memory_space<vmem>>, %arg6: memref<56x128xf32, #tpu.memory_space<vmem>>) attributes {dimension_semantics = [#tpu.dimension_semantics<parallel>, #tpu.dimension_semantics<arbitrary>], iteration_bounds = array<i64: 1, 1>, scalar_prefetch = 0 : i64, scratch_operands = 1 : i64, tpu.core_type = #tpu.core_type<tc>, window_params = [{transform_indices = @transform_0, window_bounds = array<i64: 56, 128>}, {transform_indices = @transform_1, window_bounds = array<i64: 128, 128>}, {pipeline_mode = #tpu.pipeline_mode<synchronous>, transform_indices = @transform_2, window_bounds = array<i64: 1, 128>}, {transform_indices = @transform_3, window_bounds = array<i64: 56, 128>}]} {
    %c0_i32 = arith.constant 0 : i32
    %0 = arith.cmpi eq, %arg1, %c0_i32 : i32
    %1 = arith.extui %0 : i1 to i32
    %c0_i32_0 = arith.constant 0 : i32
    %2 = arith.cmpi ne, %1, %c0_i32_0 : i32
    scf.if %2 {
      %cst_10 = arith.constant 0.000000e+00 : f32
      %12 = vector.broadcast %cst_10 : f32 to vector<56x128xf32>
      %c0_11 = arith.constant 0 : index
      %c0_12 = arith.constant 0 : index
      %13 = vector.load %arg6[%c0_11, %c0_12] : memref<56x128xf32, #tpu.memory_space<vmem>>, vector<56x128xf32>
      tpu.vector_store %arg6[%c0_11, %c0_12], %12 {strides = array<i32>} : memref<56x128xf32, #tpu.memory_space<vmem>>, vector<56x128xf32>,
    } else {
    }
    %c0 = arith.constant 0 : index
    %c0_1 = arith.constant 0 : index
    %3 = vector.load %arg6[%c0, %c0_1] : memref<56x128xf32, #tpu.memory_space<vmem>>, vector<56x128xf32>
    %c0_2 = arith.constant 0 : index
    %c0_3 = arith.constant 0 : index
    %4 = vector.load %arg2[%c0_2, %c0_3] : memref<56x128xbf16, #tpu.memory_space<vmem>>, vector<56x128xbf16>
    %c0_4 = arith.constant 0 : index
    %c0_5 = arith.constant 0 : index
    %5 = vector.load %arg3[%c0_4, %c0_5] : memref<128x128xbf16, #tpu.memory_space<vmem>>, vector<128x128xbf16>
    %cst = arith.constant dense<0.000000e+00> : vector<56x128xf32>
    %6 = tpu.matmul %4, %5, %cst {dimension_numbers = #tpu.dot_dimension_numbers<[1], [0], [0], [1], [0, 0, 1, 1], [], []>} : vector<56x128xbf16>, vector<128x128xbf16>, vector<56x128xf32> -> vector<56x128xf32>
    %7 = arith.addf %3, %6 : vector<56x128xf32>
    %c0_6 = arith.constant 0 : index
    %c0_7 = arith.constant 0 : index
    %8 = vector.load %arg6[%c0_6, %c0_7] : memref<56x128xf32, #tpu.memory_space<vmem>>, vector<56x128xf32>
    tpu.vector_store %arg6[%c0_6, %c0_7], %7 {strides = array<i32>} : memref<56x128xf32, #tpu.memory_space<vmem>>, vector<56x128xf32>,
    %c0_i32_8 = arith.constant 0 : i32
    %9 = arith.cmpi eq, %arg1, %c0_i32_8 : i32
    %10 = arith.extui %9 : i1 to i32
    %c0_i32_9 = arith.constant 0 : i32
    %11 = arith.cmpi ne, %10, %c0_i32_9 : i32
    scf.if %11 {
      %c0_10 = arith.constant 0 : index
      %c0_11 = arith.constant 0 : index
      %12 = vector.load %arg6[%c0_10, %c0_11] : memref<56x128xf32, #tpu.memory_space<vmem>>, vector<56x128xf32>
      %c0_12 = arith.constant 0 : index
      %c0_13 = arith.constant 0 : index
      %13 = vector.load %arg4[%c0_12, %c0_13] : memref<1x128xf32, #tpu.memory_space<vmem>>, vector<1x128xf32>
      %14 = vector.broadcast %13 : vector<1x128xf32> to vector<56x128xf32>
      %15 = arith.addf %12, %14 : vector<56x128xf32>
      %c0_14 = arith.constant 0 : index
      %c0_15 = arith.constant 0 : index
      %16 = vector.load %arg5[%c0_14, %c0_15] : memref<56x128xf32, #tpu.memory_space<vmem>>, vector<56x128xf32>
      tpu.vector_store %arg5[%c0_14, %c0_15], %15 {strides = array<i32>} : memref<56x128xf32, #tpu.memory_space<vmem>>, vector<56x128xf32>,
    } else {
    }
    return
  }
  func.func @transform_0(%arg0: i32, %arg1: i32) -> (i32, i32) {
    %c0_i32 = arith.constant 0 : i32
    return %arg0, %arg1 : i32, i32
  }
  func.func @transform_1(%arg0: i32, %arg1: i32) -> (i32, i32) {
    %c0_i32 = arith.constant 0 : i32
    %c0_i32_0 = arith.constant 0 : i32
    return %arg1, %c0_i32 : i32, i32
  }
  func.func @transform_2(%arg0: i32, %arg1: i32) -> (i32, i32) {
    %c0_i32 = arith.constant 0 : i32
    %c0_i32_0 = arith.constant 0 : i32
    %c0_i32_1 = arith.constant 0 : i32
    return %c0_i32, %c0_i32_0 : i32, i32
  }
  func.func @transform_3(%arg0: i32, %arg1: i32) -> (i32, i32) {
    %c0_i32 = arith.constant 0 : i32
    %c0_i32_0 = arith.constant 0 : i32
    return %arg0, %c0_i32 : i32, i32
  }
}

</mosaic_0001>

<bundles_post_ra>
// kernel: receiver_forward.1
= control target key start
LH: loop header
LB: loop body
LE: loop exit
PB: predicated region body
PF: predicated region fallthrough
CT: control target
= control target key end

     0   :  { %s396_s1 = inlined_call_operand.vmem [shape: bf16[128,128], index: 1, kind: input, shape index: {}]   ;;  %s397_s0 = inlined_call_operand.vmem [shape: bf16[56,128], index: 0, kind: input, shape index: {}]   ;;  %s398_s2 = inlined_call_operand.vmem [shape: f32[1,128], index: 2, kind: input, shape index: {}]   ;;  %s399_s3 = inlined_call_operand.vmem [shape: f32[56,128], index: 3, kind: output, shape index: {}]  }
   0x1   :  { %v304_v0 = vld [vmem:[%s396_s1] sm:$0xff]   ;;  %v305_v1 = vld [vmem:[%s396_s1 + $0x8] sm:$0xff]   ;;  %v306_v2 = vld [vmem:[%s396_s1 + $0x10] sm:$0xff]  }
   0x2   :  { %264 = vmatprep.subr.bf16.mxu0 %v304_v0  ;;  %288 = vmatprep.subr.bf16.mxu1 %v304_v0  ;;  %v307_v3 = vld [vmem:[%s396_s1 + $0x18] sm:$0xff]   ;;  %v312_v4 = vld [vmem:[%s397_s0] sm:$0xff]   ;;  %v313_v5 = vld [vmem:[%s397_s0 + $0x10] sm:$0xff]  }
   0x3   :  { %265 = vmatpush3.bf16.msra.mxu0 %v304_v0  ;;  %296 = vmatpush3.bf16.msra.mxu1 %v304_v0  ;;  %v308_v6 = vld [vmem:[%s396_s1 + $0x20] sm:$0xff]   ;;  %v309_v7 = vld [vmem:[%s396_s1 + $0x28] sm:$0xff]   ;;  %v310_v8 = vld [vmem:[%s396_s1 + $0x30] sm:$0xff]  }
   0x4   :  { %266 = vmatprep.subr.bf16.mxu0 %v305_v1  ;;  %289 = vmatprep.subr.bf16.mxu1 %v305_v1  ;;  %v311_v9 = vld [vmem:[%s396_s1 + $0x38] sm:$0xff]   ;;  %v314_v10 = vld [vmem:[%s397_s0 + $0x8] sm:$0xff]   ;;  %v251_v12 = vld [vmem:[%s398_s2] ss:$0 sm:$0xff] }
   0x5   :  { %280 = vmatprep.mubr.bf16.mxu0 %v312_v4  ;;  %284 = vmatprep.mubr.bf16.mxu1 %v313_v5  ;;  %v315_v11 = vld [vmem:[%s397_s0 + $0x18] ss:$0 sps:$4 sm:$0xff]  }
   0x7   :  { %267 = vmatpush3.bf16.msra.mxu0 %v305_v1  ;;  %297 = vmatpush3.bf16.msra.mxu1 %v305_v1 }
   0x8   :  { %268 = vmatprep.subr.bf16.mxu0 %v306_v2  ;;  %290 = vmatprep.subr.bf16.mxu1 %v306_v2 }
   0xb   :  { %269 = vmatpush3.bf16.msra.mxu0 %v306_v2  ;;  %298 = vmatpush3.bf16.msra.mxu1 %v306_v2 }
   0xc   :  { %270 = vmatprep.subr.bf16.mxu0 %v307_v3  ;;  %291 = vmatprep.subr.bf16.mxu1 %v307_v3 }
   0xf   :  { %271 = vmatpush3.bf16.msra.mxu0 %v307_v3  ;;  %299 = vmatpush3.bf16.msra.mxu1 %v307_v3 }
  0x10   :  { %272 = vmatprep.subr.bf16.mxu0 %v308_v6  ;;  %292 = vmatprep.subr.bf16.mxu1 %v308_v6 }
  0x13   :  { %273 = vmatpush3.bf16.msra.mxu0 %v308_v6  ;;  %300 = vmatpush3.bf16.msra.mxu1 %v308_v6 }
  0x14   :  { %274 = vmatprep.subr.bf16.mxu0 %v309_v7  ;;  %293 = vmatprep.subr.bf16.mxu1 %v309_v7 }
  0x17   :  { %275 = vmatpush3.bf16.msra.mxu0 %v309_v7  ;;  %301 = vmatpush3.bf16.msra.mxu1 %v309_v7 }
  0x18   :  { %276 = vmatprep.subr.bf16.mxu0 %v310_v8  ;;  %294 = vmatprep.subr.bf16.mxu1 %v310_v8 }
  0x1b   :  { %277 = vmatpush3.bf16.msra.mxu0 %v310_v8  ;;  %302 = vmatpush3.bf16.msra.mxu1 %v310_v8 }
  0x1c   :  { %278 = vmatprep.subr.bf16.mxu0 %v311_v9  ;;  %295 = vmatprep.subr.bf16.mxu1 %v311_v9 }
  0x1f   :  { %279 = vmatpush3.bf16.msra.mxu0 %v311_v9  ;;  %303 = vmatpush3.bf16.msra.mxu1 %v311_v9 }
  0x22   :  { %281 = vmatmul.mubr.bf16.vlgmr.msra.gmra.mrb[0].mxu0 %v314_v10  ;;  %285 = vmatmul.mubr.bf16.vlgmr.msra.gmra.mrb[0].mxu1 %v315_v11 }
  0xf5   :  { %v282_v13 = vpop.f32.mrb[0].mxu0  ;;  %v286_v14 = vpop.f32.mrb[0].mxu1 }
  0xf6   :  { %v223_v15 = vadd.f32 %v282_v13, %v251_v12  ;;  %v227_v16 = vadd.f32 %v286_v14, %v251_v12  ;;  %v160_v17 = vpop.f32.mrb[1].mxu0  ;;  %v176_v18 = vpop.f32.mrb[1].mxu1 }
  0xf7   :  { %v221_v19 = vadd.f32 %v251_v12, %v160_v17  ;;  %v225_v20 = vadd.f32 %v251_v12, %v176_v18  ;;  %v283_v21 = vpop.f32.mrb[2].mxu0  ;;  %v287_v22 = vpop.f32.mrb[2].mxu1 }
  0xf8   :  { %230 = vst [vmem:[%s399_s3 + $0x10] sm:$0xff] %v223_v15  ;;  %234 = vst [vmem:[%s399_s3 + $0x30] sm:$0xff] %v227_v16  ;;  %v224_v23 = vadd.f32 %v283_v21, %v251_v12  ;;  %v163_v24 = vpop.f32.mrb[3].mxu0  ;;  %v179_v25 = vpop.f32.mrb[3].mxu1 }
  0xf9   :  { %228 = vst [vmem:[%s399_s3] sm:$0xff] %v221_v19  ;;  %232 = vst [vmem:[%s399_s3 + $0x20] sm:$0xff] %v225_v20  ;;  %v222_v26 = vadd.f32 %v251_v12, %v163_v24  ;;  %v226_v27 = vadd.f32 %v251_v12, %v179_v25 }
  0xfa   :  { %231 = vst [vmem:[%s399_s3 + $0x18] sm:$0xff] %v224_v23 }
  0xfb   :  { %229 = vst [vmem:[%s399_s3 + $0x8] sm:$0xff] %v222_v26  ;;  %233 = vst [vmem:[%s399_s3 + $0x28] sm:$0xff] %v226_v27 }

</bundles_post_ra>
